<compile_context>
chip_gen: v7x
topology: tpu7x:2x2x1
jax: 0.10.0
libtpu: 0.0.40
codegen_flags: <defaults>
</compile_context>

<pallas_src>
import jax
import jax.numpy as jnp
from jax.experimental import pallas as pl
from jax.experimental.pallas import tpu as pltpu


def mlp_kernel(x_ref, w1_ref, b1_ref, w2_ref, b2_ref, o_ref):
    # x arrives already ReLU'd and cast to bf16 (done in the wrapper; exact).
    h = jnp.dot(x_ref[...], w1_ref[...],
                preferred_element_type=jnp.float32)        # Linear 1 (MXU, f32 acc)
    h = jnp.maximum(h + b1_ref[...], 0.0)                  # bias + ReLU (fp32 VPU)
    out = jnp.dot(h.astype(jnp.bfloat16), w2_ref[...],
                  preferred_element_type=jnp.float32)      # Linear 2 (MXU, f32 acc)
    out = out + b2_ref[...]
    o_ref[...] = out.astype(o_ref.dtype)                   # bf16 lane-dense store


def _round_up(x, m):
    return ((x + m - 1) // m) * m


def _cdiv(a, b):
    return (a + b - 1) // b


def mlp_module_forward(x, w1, b1, w2, b2, *, num_frames, img_feature_dim):
    """Pallas implementation of MLPmodule.forward.

    x : (B, num_frames, img_feature_dim) float32
    w1: (D, 512), b1: (512,), w2: (512, num_class), b2: (num_class,)
    (weights stored (in, out): x @ W + b == torch's x @ W.T + b)
    returns: (B, num_class) float32
    """
    B = x.shape[0]
    D = num_frames * img_feature_dim
    num_bottleneck = w1.shape[1]
    num_class = w2.shape[1]

    # torch: input.view(B, nf*dim).  ReLU commutes with the bf16 cast, so apply
    # both here and stream x into the kernel in bf16 (halves the x HBM stream).
    x2d = jnp.maximum(x.reshape(B, D).astype(jnp.float32), 0.0).astype(jnp.bfloat16)

    # --- lane-dense output: zero-pad num_class up to a multiple of 128 --------
    NCp = _round_up(num_class, 128)
    w2p = jnp.pad(w2, ((0, 0), (0, NCp - num_class)))
    b2p = jnp.pad(b2, ((0, NCp - num_class),))

    # Weights in bf16 (full-rate MXU, half the DMA); biases stay fp32.
    w1_bf = w1.astype(jnp.bfloat16)
    w2_bf = w2p.astype(jnp.bfloat16)
    b1_2d = b1.reshape(1, num_bottleneck).astype(jnp.float32)
    b2_2d = b2p.reshape(1, NCp).astype(jnp.float32)

    # --- batch tiling: VMEM-budgeted tile, minimal padding, >=2 grid steps ----
    # Per-row VMEM for the streamed operands (double-buffered bf16 x + bf16 out).
    stream_per_row = 2 * (D * 2) + 2 * (NCp * 2)
    # Resident operands; assume double-buffered in case Buffered(1) falls back.
    weight_vmem = (D * num_bottleneck * 2 + num_bottleneck * NCp * 2
                   + num_bottleneck * 4 + NCp * 4)
    VMEM_BUDGET = 40 << 20                         # conservative for v7x (64 MiB)
    stream_budget = max(VMEM_BUDGET - 2 * weight_vmem, 1 << 20)
    tb_cap = max(16, min(1024, (stream_budget // stream_per_row) // 16 * 16))

    B16 = _round_up(max(B, 1), 16)                 # 16 = native bf16 sublane tile
    # Prefer >=4 grid steps when batch allows (pipelining + v7x's 2 TensorCores),
    # but never shrink tiles below 64 rows just to get there.
    desired_steps = 4 if B16 >= 256 else (2 if B16 >= 128 else 1)
    n_tiles = max(_cdiv(B16, tb_cap), desired_steps)
    TB = _round_up(_cdiv(B16, n_tiles), 16)
    Bp = TB * n_tiles                              # small padding (<= 16*n_tiles-1)

    if Bp != B:
        x2d = jnp.pad(x2d, ((0, Bp - B), (0, 0)))  # zero rows, sliced off below

    flops = 2 * Bp * (D * num_bottleneck + num_bottleneck * NCp)
    bytes_accessed = (Bp * D * 2                       # x stream (bf16)
                      + D * num_bottleneck * 2         # W1 (bf16, fetched once)
                      + num_bottleneck * NCp * 2       # W2 (bf16, fetched once)
                      + num_bottleneck * 4 + NCp * 4   # biases (fp32)
                      + Bp * NCp * 2)                  # output (bf16)

    vmem_need = 2 * weight_vmem + TB * stream_per_row + (1 << 20)
    vmem_limit_bytes = int(max(min(2 * vmem_need, 48 << 20), vmem_need, 16 << 20))

    def make_call(single_buffer_weights):
        wkw = dict(pipeline_mode=pl.Buffered(1)) if single_buffer_weights else {}
        grid_spec = pl.GridSpec(
            grid=(n_tiles,),
            in_specs=[
                # activations stream over the batch grid axis (double-buffered bf16)
                pl.BlockSpec((TB, D), lambda i: (i, 0)),
                # weights/biases: constant index_map -> DMA'd once, VMEM-resident
                pl.BlockSpec((D, num_bottleneck), lambda i: (0, 0), **wkw),
                pl.BlockSpec((1, num_bottleneck), lambda i: (0, 0), **wkw),
                pl.BlockSpec((num_bottleneck, NCp), lambda i: (0, 0), **wkw),
                pl.BlockSpec((1, NCp), lambda i: (0, 0), **wkw),
            ],
            out_specs=pl.BlockSpec((TB, NCp), lambda i: (i, 0)),
        )
        return pl.pallas_call(
            mlp_kernel,
            out_shape=jax.ShapeDtypeStruct((Bp, NCp), jnp.bfloat16),
            grid_spec=grid_spec,
            compiler_params=pltpu.CompilerParams(
                # batch axis is embarrassingly parallel -> v7x shards it over 2 TCs;
                # neutral on v5e/v6e (single TC).
                dimension_semantics=("parallel",),
                vmem_limit_bytes=vmem_limit_bytes,
            ),
            cost_estimate=pl.CostEstimate(
                flops=flops, transcendentals=0, bytes_accessed=bytes_accessed),
        )

    args = (x2d, w1_bf, b1_2d, w2_bf, b2_2d)
    try:
        out_padded = make_call(True)(*args)
    except Exception:
        # TODO(synk): pl.Buffered(1) single-buffering of the resident weights is a
        # VMEM-only optimization; fall back if this jax/Mosaic build rejects it.
        out_padded = make_call(False)(*args)

    # strip batch + class padding; return fp32 like the torch module
    return out_padded[:B, :num_class].astype(jnp.float32)


def reference_forward(x, w1, b1, w2, b2, *, num_frames, img_feature_dim):
    # Mirrors the kernel's numerics (bf16 matmul operands, fp32 accumulate,
    # bf16 output store) so the comparison is tight.
    B = x.shape[0]
    x2d = jnp.maximum(x.reshape(B, num_frames * img_feature_dim), 0.0)
    h = jnp.dot(x2d.astype(jnp.bfloat16), w1.astype(jnp.bfloat16),
                preferred_element_type=jnp.float32) + b1
    h = jnp.maximum(h, 0.0)
    out = jnp.dot(h.astype(jnp.bfloat16), w2.astype(jnp.bfloat16),
                  preferred_element_type=jnp.float32) + b2
    return out.astype(jnp.bfloat16).astype(jnp.float32)


if __name__ == "__main__":
    # MLPmodule(img_feature_dim=32, num_frames=8, num_class=10)
    img_feature_dim = 32
    num_frames = 8
    num_class = 10
    num_bottleneck = 512
    B = 2
    D = num_frames * img_feature_dim

    key = jax.random.PRNGKey(0)
    kx, kw1, kb1, kw2, kb2 = jax.random.split(key, 5)

    x = jax.random.normal(kx, (B, num_frames, img_feature_dim), dtype=jnp.float32)
    # Deterministic parameter init (uniform, like torch Linear default scale).
    w1 = jax.random.uniform(kw1, (D, num_bottleneck), jnp.float32,
                            minval=-1.0 / (D ** 0.5), maxval=1.0 / (D ** 0.5))
    b1 = jax.random.uniform(kb1, (num_bottleneck,), jnp.float32,
                            minval=-1.0 / (D ** 0.5), maxval=1.0 / (D ** 0.5))
    w2 = jax.random.uniform(kw2, (num_bottleneck, num_class), jnp.float32,
                            minval=-1.0 / (num_bottleneck ** 0.5),
                            maxval=1.0 / (num_bottleneck ** 0.5))
    b2 = jax.random.uniform(kb2, (num_class,), jnp.float32,
                            minval=-1.0 / (num_bottleneck ** 0.5),
                            maxval=1.0 / (num_bottleneck ** 0.5))

    out = mlp_module_forward(x, w1, b1, w2, b2,
                             num_frames=num_frames,
                             img_feature_dim=img_feature_dim)
    out = jax.block_until_ready(out)

    ref = reference_forward(x, w1, b1, w2, b2,
                            num_frames=num_frames,
                            img_feature_dim=img_feature_dim)
    assert out.shape == (B, num_class)
    assert jnp.allclose(out, ref, atol=2e-2, rtol=2e-2), "mismatch vs reference"

    print("KERNEL_OK")
</pallas_src>

<mosaic_0001>
module attributes {stable_mosaic.version = 11 : i64} {
  func.func @mlp_kernel(%arg0: i32, %arg1: memref<16x256xbf16, #tpu.memory_space<vmem>>, %arg2: memref<256x512xbf16, #tpu.memory_space<vmem>>, %arg3: memref<1x512xf32, #tpu.memory_space<vmem>>, %arg4: memref<512x128xbf16, #tpu.memory_space<vmem>>, %arg5: memref<1x128xf32, #tpu.memory_space<vmem>>, %arg6: memref<16x128xbf16, #tpu.memory_space<vmem>>) attributes {dimension_semantics = [#tpu.dimension_semantics<parallel>], iteration_bounds = array<i64: 1>, scalar_prefetch = 0 : i64, scratch_operands = 0 : i64, tpu.core_type = #tpu.core_type<tc>, window_params = [{transform_indices = @transform_0, window_bounds = array<i64: 16, 256>}, {pipeline_mode = #tpu.pipeline_mode<synchronous>, transform_indices = @transform_1, window_bounds = array<i64: 256, 512>}, {pipeline_mode = #tpu.pipeline_mode<synchronous>, transform_indices = @transform_2, window_bounds = array<i64: 1, 512>}, {pipeline_mode = #tpu.pipeline_mode<synchronous>, transform_indices = @transform_3, window_bounds = array<i64: 512, 128>}, {pipeline_mode = #tpu.pipeline_mode<synchronous>, transform_indices = @transform_4, window_bounds = array<i64: 1, 128>}, {transform_indices = @transform_5, window_bounds = array<i64: 16, 128>}]} {
    %c0 = arith.constant 0 : index
    %c0_0 = arith.constant 0 : index
    %0 = vector.load %arg1[%c0, %c0_0] : memref<16x256xbf16, #tpu.memory_space<vmem>>, vector<16x256xbf16>
    %c0_1 = arith.constant 0 : index
    %c0_2 = arith.constant 0 : index
    %1 = vector.load %arg2[%c0_1, %c0_2] : memref<256x512xbf16, #tpu.memory_space<vmem>>, vector<256x512xbf16>
    %cst = arith.constant dense<0.000000e+00> : vector<16x512xf32>
    %2 = tpu.matmul %0, %1, %cst {dimension_numbers = #tpu.dot_dimension_numbers<[1], [0], [0], [1], [0, 0, 1, 1], [], []>} : vector<16x256xbf16>, vector<256x512xbf16>, vector<16x512xf32> -> vector<16x512xf32>
    %c0_3 = arith.constant 0 : index
    %c0_4 = arith.constant 0 : index
    %3 = vector.load %arg3[%c0_3, %c0_4] : memref<1x512xf32, #tpu.memory_space<vmem>>, vector<1x512xf32>
    %4 = vector.broadcast %3 : vector<1x512xf32> to vector<16x512xf32>
    %5 = arith.addf %2, %4 : vector<16x512xf32>
    %cst_5 = arith.constant 0.000000e+00 : f32
    %6 = vector.broadcast %cst_5 : f32 to vector<16x512xf32>
    %7 = arith.maximumf %5, %6 : vector<16x512xf32>
    %8 = arith.truncf %7 : vector<16x512xf32> to vector<16x512xbf16>
    %c0_6 = arith.constant 0 : index
    %c0_7 = arith.constant 0 : index
    %9 = vector.load %arg4[%c0_6, %c0_7] : memref<512x128xbf16, #tpu.memory_space<vmem>>, vector<512x128xbf16>
    %cst_8 = arith.constant dense<0.000000e+00> : vector<16x128xf32>
    %10 = tpu.matmul %8, %9, %cst_8 {dimension_numbers = #tpu.dot_dimension_numbers<[1], [0], [0], [1], [0, 0, 1, 1], [], []>} : vector<16x512xbf16>, vector<512x128xbf16>, vector<16x128xf32> -> vector<16x128xf32>
    %c0_9 = arith.constant 0 : index
    %c0_10 = arith.constant 0 : index
    %11 = vector.load %arg5[%c0_9, %c0_10] : memref<1x128xf32, #tpu.memory_space<vmem>>, vector<1x128xf32>
    %12 = vector.broadcast %11 : vector<1x128xf32> to vector<16x128xf32>
    %13 = arith.addf %10, %12 : vector<16x128xf32>
    %14 = arith.truncf %13 : vector<16x128xf32> to vector<16x128xbf16>
    %c0_11 = arith.constant 0 : index
    %c0_12 = arith.constant 0 : index
    %15 = vector.load %arg6[%c0_11, %c0_12] : memref<16x128xbf16, #tpu.memory_space<vmem>>, vector<16x128xbf16>
    tpu.vector_store %arg6[%c0_11, %c0_12], %14 {strides = array<i32>} : memref<16x128xbf16, #tpu.memory_space<vmem>>, vector<16x128xbf16>,
    return
  }
  func.func @transform_0(%arg0: i32) -> (i32, i32) {
    %c0_i32 = arith.constant 0 : i32
    %c0_i32_0 = arith.constant 0 : i32
    return %arg0, %c0_i32 : i32, i32
  }
  func.func @transform_1(%arg0: i32) -> (i32, i32) {
    %c0_i32 = arith.constant 0 : i32
    %c0_i32_0 = arith.constant 0 : i32
    %c0_i32_1 = arith.constant 0 : i32
    return %c0_i32, %c0_i32_0 : i32, i32
  }
  func.func @transform_2(%arg0: i32) -> (i32, i32) {
    %c0_i32 = arith.constant 0 : i32
    %c0_i32_0 = arith.constant 0 : i32
    %c0_i32_1 = arith.constant 0 : i32
    return %c0_i32, %c0_i32_0 : i32, i32
  }
  func.func @transform_3(%arg0: i32) -> (i32, i32) {
    %c0_i32 = arith.constant 0 : i32
    %c0_i32_0 = arith.constant 0 : i32
    %c0_i32_1 = arith.constant 0 : i32
    return %c0_i32, %c0_i32_0 : i32, i32
  }
  func.func @transform_4(%arg0: i32) -> (i32, i32) {
    %c0_i32 = arith.constant 0 : i32
    %c0_i32_0 = arith.constant 0 : i32
    %c0_i32_1 = arith.constant 0 : i32
    return %c0_i32, %c0_i32_0 : i32, i32
  }
  func.func @transform_5(%arg0: i32) -> (i32, i32) {
    %c0_i32 = arith.constant 0 : i32
    %c0_i32_0 = arith.constant 0 : i32
    return %arg0, %c0_i32 : i32, i32
  }
}

module attributes {stable_mosaic.version = 11 : i64} {
  func.func @mlp_kernel(%arg0: i32, %arg1: memref<16x256xbf16, #tpu.memory_space<vmem>>, %arg2: memref<256x512xbf16, #tpu.memory_space<vmem>>, %arg3: memref<1x512xf32, #tpu.memory_space<vmem>>, %arg4: memref<512x128xbf16, #tpu.memory_space<vmem>>, %arg5: memref<1x128xf32, #tpu.memory_space<vmem>>, %arg6: memref<16x128xbf16, #tpu.memory_space<vmem>>) attributes {dimension_semantics = [#tpu.dimension_semantics<parallel>], iteration_bounds = array<i64: 1>, scalar_prefetch = 0 : i64, scratch_operands = 0 : i64, tpu.core_type = #tpu.core_type<tc>, window_params = [{transform_indices = @transform_0, window_bounds = array<i64: 16, 256>}, {pipeline_mode = #tpu.pipeline_mode<synchronous>, transform_indices = @transform_1, window_bounds = array<i64: 256, 512>}, {pipeline_mode = #tpu.pipeline_mode<synchronous>, transform_indices = @transform_2, window_bounds = array<i64: 1, 512>}, {pipeline_mode = #tpu.pipeline_mode<synchronous>, transform_indices = @transform_3, window_bounds = array<i64: 512, 128>}, {pipeline_mode = #tpu.pipeline_mode<synchronous>, transform_indices = @transform_4, window_bounds = array<i64: 1, 128>}, {transform_indices = @transform_5, window_bounds = array<i64: 16, 128>}]} {
    %c0 = arith.constant 0 : index
    %c0_0 = arith.constant 0 : index
    %0 = vector.load %arg1[%c0, %c0_0] : memref<16x256xbf16, #tpu.memory_space<vmem>>, vector<16x256xbf16>
    %c0_1 = arith.constant 0 : index
    %c0_2 = arith.constant 0 : index
    %1 = vector.load %arg2[%c0_1, %c0_2] : memref<256x512xbf16, #tpu.memory_space<vmem>>, vector<256x512xbf16>
    %cst = arith.constant dense<0.000000e+00> : vector<16x512xf32>
    %2 = tpu.matmul %0, %1, %cst {dimension_numbers = #tpu.dot_dimension_numbers<[1], [0], [0], [1], [0, 0, 1, 1], [], []>} : vector<16x256xbf16>, vector<256x512xbf16>, vector<16x512xf32> -> vector<16x512xf32>
    %c0_3 = arith.constant 0 : index
    %c0_4 = arith.constant 0 : index
    %3 = vector.load %arg3[%c0_3, %c0_4] : memref<1x512xf32, #tpu.memory_space<vmem>>, vector<1x512xf32>
    %4 = vector.broadcast %3 : vector<1x512xf32> to vector<16x512xf32>
    %5 = arith.addf %2, %4 : vector<16x512xf32>
    %cst_5 = arith.constant 0.000000e+00 : f32
    %6 = vector.broadcast %cst_5 : f32 to vector<16x512xf32>
    %7 = arith.maximumf %5, %6 : vector<16x512xf32>
    %8 = arith.truncf %7 : vector<16x512xf32> to vector<16x512xbf16>
    %c0_6 = arith.constant 0 : index
    %c0_7 = arith.constant 0 : index
    %9 = vector.load %arg4[%c0_6, %c0_7] : memref<512x128xbf16, #tpu.memory_space<vmem>>, vector<512x128xbf16>
    %cst_8 = arith.constant dense<0.000000e+00> : vector<16x128xf32>
    %10 = tpu.matmul %8, %9, %cst_8 {dimension_numbers = #tpu.dot_dimension_numbers<[1], [0], [0], [1], [0, 0, 1, 1], [], []>} : vector<16x512xbf16>, vector<512x128xbf16>, vector<16x128xf32> -> vector<16x128xf32>
    %c0_9 = arith.constant 0 : index
    %c0_10 = arith.constant 0 : index
    %11 = vector.load %arg5[%c0_9, %c0_10] : memref<1x128xf32, #tpu.memory_space<vmem>>, vector<1x128xf32>
    %12 = vector.broadcast %11 : vector<1x128xf32> to vector<16x128xf32>
    %13 = arith.addf %10, %12 : vector<16x128xf32>
    %14 = arith.truncf %13 : vector<16x128xf32> to vector<16x128xbf16>
    %c0_11 = arith.constant 0 : index
    %c0_12 = arith.constant 0 : index
    %15 = vector.load %arg6[%c0_11, %c0_12] : memref<16x128xbf16, #tpu.memory_space<vmem>>, vector<16x128xbf16>
    tpu.vector_store %arg6[%c0_11, %c0_12], %14 {strides = array<i32>} : memref<16x128xbf16, #tpu.memory_space<vmem>>, vector<16x128xbf16>,
    return
  }
  func.func @transform_0(%arg0: i32) -> (i32, i32) {
    %c0_i32 = arith.constant 0 : i32
    %c0_i32_0 = arith.constant 0 : i32
    return %arg0, %c0_i32 : i32, i32
  }
  func.func @transform_1(%arg0: i32) -> (i32, i32) {
    %c0_i32 = arith.constant 0 : i32
    %c0_i32_0 = arith.constant 0 : i32
    %c0_i32_1 = arith.constant 0 : i32
    return %c0_i32, %c0_i32_0 : i32, i32
  }
  func.func @transform_2(%arg0: i32) -> (i32, i32) {
    %c0_i32 = arith.constant 0 : i32
    %c0_i32_0 = arith.constant 0 : i32
    %c0_i32_1 = arith.constant 0 : i32
    return %c0_i32, %c0_i32_0 : i32, i32
  }
  func.func @transform_3(%arg0: i32) -> (i32, i32) {
    %c0_i32 = arith.constant 0 : i32
    %c0_i32_0 = arith.constant 0 : i32
    %c0_i32_1 = arith.constant 0 : i32
    return %c0_i32, %c0_i32_0 : i32, i32
  }
  func.func @transform_4(%arg0: i32) -> (i32, i32) {
    %c0_i32 = arith.constant 0 : i32
    %c0_i32_0 = arith.constant 0 : i32
    %c0_i32_1 = arith.constant 0 : i32
    return %c0_i32, %c0_i32_0 : i32, i32
  }
  func.func @transform_5(%arg0: i32) -> (i32, i32) {
    %c0_i32 = arith.constant 0 : i32
    %c0_i32_0 = arith.constant 0 : i32
    return %arg0, %c0_i32 : i32, i32
  }
}

</mosaic_0001>

<bundles_post_ra>
// kernel: tpu_custom_call.1
= control target key start
LH: loop header
LB: loop body
LE: loop exit
PB: predicated region body
PF: predicated region fallthrough
CT: control target
= control target key end

     0   :  { %10 = vsyncpa [#allocation3], 0  ;;  %s1439_s0 = inlined_call_operand.hbm [shape: bf16[16,256], index: 0, kind: input, shape index: {}]   ;;  %s1440_s1 = inlined_call_operand.hbm [shape: bf16[256,512], index: 1, kind: input, shape index: {}]   ;;  %s1441_s2 = inlined_call_operand.vmem [shape: f32[1,512], index: 2, kind: input, shape index: {}]   ;;  %s1442_s3 = inlined_call_operand.hbm [shape: bf16[512,128], index: 3, kind: input, shape index: {}]   ;;  %s1443_s4 = inlined_call_operand.vmem [shape: f32[1,128], index: 4, kind: input, shape index: {}]   ;;  %s1444_s5 = inlined_call_operand.hbm [shape: bf16[16,128], index: 5, kind: output, shape index: {}]  }
   0x1   :  { %11 = vsyncpa [#allocation6], 0 }
   0x2   :  { %12 = vsyncpa [#allocation4], 0  ;;  %s1339_s18 = smov [#allocation5]   ;;  %s1245_s22 = scalar_lea.hbm %s1440_s1, 8192 }
   0x3   :  { %s30_s19 = sshll.u32 %s1339_s18, 4  ;;  %p1246_p0 = scmp.ne.s32.totalorder %s1440_s1, %s1245_s22  ;;  %s31_s19 = int_to_ptr.vmem [resolvable:$true] %s30_s19 }
   0x4   :  { %p1249_p1 = scmp.lt.u32.totalorder %s1245_s22, %s1440_s1 }
   0x6   :  { %p1251_p2 = pnand %p1249_p1, %p1246_p0 }
   0x8   :  { %1254 = shalt.err (!%p1251_p2)
}
   0x9   :  { %s1255_s27 = scalar_lea.vmem %s31_s19, 8192  ;;  %p1260_p4 = scmp.lt.s32.totalorder %s31_s19, %s31_s19 }
   0xa   :  { %p1256_p3 = scmp.ne.s32.totalorder %s31_s19, %s1255_s27  ;;  %p1261_p5 = scmp.lt.s32.totalorder %s1255_s27, %s1255_s27 }
   0xc   :  { %p1262_p6 = por %p1261_p5, %p1260_p4 }
   0xe   :  { %p1263_p7 = pnand %p1262_p6, %p1256_p3 }
  0x10   :  { %1266 = shalt.err (!%p1263_p7)
}
  0x11   :  { %s1340_s28 = smov 256   ;;  %s1341_s29 = smov 16  }
  0x12   :  { %36 = dma.hbm_to_vmem [thread:$0]  %s1440_s1, 8192, %s31_s19, [#allocation6], %s1340_s28, %s1340_s28, %s1341_s29  }
  0x13   :  { %s1342_s7 = smov [#allocation2]   ;;  %s1267_s11 = scalar_lea.hbm %s1439_s0, 256 }
  0x14   :  { %s18_s8 = sshll.u32 %s1342_s7, 4  ;;  %p1268_p8 = scmp.ne.s32.totalorder %s1439_s0, %s1267_s11  ;;  %s19_s8 = int_to_ptr.vmem [resolvable:$true] %s18_s8 }
  0x15   :  { %p1271_p9 = scmp.lt.u32.totalorder %s1267_s11, %s1439_s0 }
  0x17   :  { %p1273_p10 = pnand %p1271_p9, %p1268_p8 }
  0x19   :  { %1276 = shalt.err (!%p1273_p10)
}
  0x1a   :  { %s1277_s16 = scalar_lea.vmem %s19_s8, 256  ;;  %p1282_p12 = scmp.lt.s32.totalorder %s19_s8, %s19_s8 }
  0x1b   :  { %p1278_p11 = scmp.ne.s32.totalorder %s19_s8, %s1277_s16  ;;  %p1283_p13 = scmp.lt.s32.totalorder %s1277_s16, %s1277_s16 }
  0x1d   :  { %p1284_p0 = por %p1283_p13, %p1282_p12 }
  0x1f   :  { %p1285_p1 = pnand %p1284_p0, %p1278_p11 }
  0x21   :  { %1288 = shalt.err (!%p1285_p1)
}
  0x22   :  { %s1343_s1 = smov 128   ;;  %s1344_s17 = smov 8  }
  0x23   :  { %24 = dma.hbm_to_vmem [thread:$0]  %s1439_s0, 256, %s19_s8, [#allocation3], %s1343_s1, %s1343_s1, %s1344_s17  }
  0x24   :  { %s1345_s20 = smov [#allocation7]   ;;  %s1289_s24 = scalar_lea.hbm %s1442_s3, 4096 }
  0x25   :  { %s44_s21 = sshll.u32 %s1345_s20, 4  ;;  %p1290_p2 = scmp.ne.s32.totalorder %s1442_s3, %s1289_s24  ;;  %s45_s21 = int_to_ptr.vmem [resolvable:$true] %s44_s21 }
  0x26   :  { %p1293_p3 = scmp.lt.u32.totalorder %s1289_s24, %s1442_s3 }
  0x28   :  { %p1295_p4 = pnand %p1293_p3, %p1290_p2 }
  0x2a   :  { %1298 = shalt.err (!%p1295_p4)
}
  0x2b   :  { %s1299_s29 = scalar_lea.vmem %s45_s21, 4096  ;;  %p1304_p6 = scmp.lt.s32.totalorder %s45_s21, %s45_s21 }
  0x2c   :  { %p1300_p5 = scmp.ne.s32.totalorder %s45_s21, %s1299_s29  ;;  %p1305_p7 = scmp.lt.s32.totalorder %s1299_s29, %s1299_s29 }
  0x2e   :  { %p1306_p8 = por %p1305_p7, %p1304_p6 }
  0x30   :  { %p1307_p9 = pnand %p1306_p8, %p1300_p5 }
  0x32   :  { %1310 = shalt.err (!%p1307_p9)
}
  0x33   :  { %s1346_s0 = smov 64   ;;  %s1347_s30 = smov 4  }
  0x34   :  { %50 = dma.hbm_to_vmem [thread:$0]  %s1442_s3, 4096, %s45_s21, [#allocation6], %s1346_s0, %s1346_s0, %s1347_s30  }
  0x35   :  { %1333 = dma.done.wait [#allocation3], 256  }
  0x36   :  { %1334 = vsyncadd [#allocation3], 4294967040 }
  0x37   :  { %1335 = dma.done.wait [#allocation6], 12288  }
  0x38   :  { %1336 = vsyncadd [#allocation6], 4294955008  ;;  %v1114_v0 = vld [vmem:[#allocation5 + $0x4] ss:$16 sps:$4 sm:$0xff]   ;;  %v1116_v1 = vld [vmem:[#allocation5 + $0xc] ss:$16 sps:$4 sm:$0xff]  }
  0x39   :  { %481 = vmatprep.subr.bf16.mxu0 %v1114_v0  ;;  %v1118_v2 = vld [vmem:[#allocation5] ss:$16 sps:$4 sm:$0xff]   ;;  %v1119_v3 = vld [vmem:[#allocation5 + $0x8] ss:$16 sps:$4 sm:$0xff]   ;;  %524 = vmatprep.subr.bf16.mxu1 %v1116_v1  ;;  %v1120_v4 = vld [vmem:[#allocation5 + $0x24] ss:$16 sps:$4 sm:$0xff]  }
  0x3a   :  { %482 = vmatpush1.bf16.msra.mxu0 %v1118_v2  ;;  %525 = vmatpush1.bf16.msra.mxu1 %v1119_v3  ;;  %v1122_v5 = vld [vmem:[#allocation5 + $0x2c] ss:$16 sps:$4 sm:$0xff]   ;;  %v1124_v6 = vld [vmem:[#allocation5 + $0x20] ss:$16 sps:$4 sm:$0xff]   ;;  %v1125_v7 = vld [vmem:[#allocation5 + $0x28] ss:$16 sps:$4 sm:$0xff]  }
  0x3b   :  { %483 = vmatprep.subr.bf16.mxu0 %v1120_v4  ;;  %526 = vmatprep.subr.bf16.mxu1 %v1122_v5  ;;  %v1126_v8 = vld [vmem:[#allocation5 + $0x44] ss:$16 sps:$4 sm:$0xff]   ;;  %v1128_v9 = vld [vmem:[#allocation5 + $0x4c] ss:$16 sps:$4 sm:$0xff]   ;;  %v1130_v10 = vld [vmem:[#allocation5 + $0x40] ss:$16 sps:$4 sm:$0xff]  }
  0x3c   :  { %v1131_v11 = vld [vmem:[#allocation5 + $0x48] ss:$16 sps:$4 sm:$0xff]   ;;  %v1132_v12 = vld [vmem:[#allocation5 + $0x64] ss:$16 sps:$4 sm:$0xff]   ;;  %v1134_v13 = vld [vmem:[#allocation5 + $0x6c] ss:$16 sps:$4 sm:$0xff]  }
  0x3d   :  { %v1136_v14 = vld [vmem:[#allocation5 + $0x60] ss:$16 sps:$4 sm:$0xff]   ;;  %v1137_v15 = vld [vmem:[#allocation5 + $0x68] ss:$16 sps:$4 sm:$0xff]   ;;  %v1138_v16 = vld [vmem:[#allocation5 + $0x84] ss:$16 sps:$4 sm:$0xff]  }
  0x3e   :  { %484 = vmatpush1.bf16.msra.mxu0 %v1124_v6  ;;  %527 = vmatpush1.bf16.msra.mxu1 %v1125_v7  ;;  %v1140_v17 = vld [vmem:[#allocation5 + $0x8c] ss:$16 sps:$4 sm:$0xff]   ;;  %v1142_v18 = vld [vmem:[#allocation5 + $0x80] ss:$16 sps:$4 sm:$0xff]   ;;  %v1143_v19 = vld [vmem:[#allocation5 + $0x88] ss:$16 sps:$4 sm:$0xff]  }
  0x3f   :  { %485 = vmatprep.subr.bf16.mxu0 %v1126_v8  ;;  %528 = vmatprep.subr.bf16.mxu1 %v1128_v9  ;;  %v1144_v20 = vld [vmem:[#allocation5 + $0xa4] ss:$16 sps:$4 sm:$0xff]   ;;  %v1146_v21 = vld [vmem:[#allocation5 + $0xac] ss:$16 sps:$4 sm:$0xff]   ;;  %v1148_v22 = vld [vmem:[#allocation5 + $0xa0] ss:$16 sps:$4 sm:$0xff]  }
  0x40   :  { %v1149_v23 = vld [vmem:[#allocation5 + $0xa8] ss:$16 sps:$4 sm:$0xff]   ;;  %v1150_v24 = vld [vmem:[#allocation5 + $0xc4] ss:$16 sps:$4 sm:$0xff]   ;;  %v1152_v25 = vld [vmem:[#allocation5 + $0xcc] ss:$16 sps:$4 sm:$0xff]  }
  0x41   :  { %v1154_v26 = vld [vmem:[#allocation5 + $0xc0] ss:$16 sps:$4 sm:$0xff]   ;;  %v1155_v27 = vld [vmem:[#allocation5 + $0xc8] ss:$16 sps:$4 sm:$0xff]   ;;  %v1156_v28 = vld [vmem:[#allocation5 + $0xe4] ss:$16 sps:$4 sm:$0xff]  }
  0x42   :  { %486 = vmatpush1.bf16.msra.mxu0 %v1130_v10  ;;  %529 = vmatpush1.bf16.msra.mxu1 %v1131_v11  ;;  %v1158_v29 = vld [vmem:[#allocation5 + $0xec] ss:$16 sps:$4 sm:$0xff]   ;;  %v1160_v30 = vld [vmem:[#allocation5 + $0xe0] ss:$16 sps:$4 sm:$0xff]   ;;  %v1161_v31 = vld [vmem:[#allocation5 + $0xe8] ss:$16 sps:$4 sm:$0xff]  }
  0x43   :  { %487 = vmatprep.subr.bf16.mxu0 %v1132_v12  ;;  %530 = vmatprep.subr.bf16.mxu1 %v1134_v13  ;;  %v1162_v32 = vld [vmem:[#allocation5 + $0x104] ss:$16 sps:$4 sm:$0xff]   ;;  %v1164_v33 = vld [vmem:[#allocation5 + $0x10c] ss:$16 sps:$4 sm:$0xff]   ;;  %v1166_v34 = vld [vmem:[#allocation5 + $0x100] ss:$16 sps:$4 sm:$0xff]  }
  0x44   :  { %v1167_v35 = vld [vmem:[#allocation5 + $0x108] ss:$16 sps:$4 sm:$0xff]   ;;  %v1168_v36 = vld [vmem:[#allocation5 + $0x124] ss:$16 sps:$4 sm:$0xff]   ;;  %v1170_v37 = vld [vmem:[#allocation5 + $0x12c] ss:$16 sps:$4 sm:$0xff]  }
  0x45   :  { %v1172_v38 = vld [vmem:[#allocation5 + $0x120] ss:$16 sps:$4 sm:$0xff]   ;;  %v1173_v39 = vld [vmem:[#allocation5 + $0x128] ss:$16 sps:$4 sm:$0xff]   ;;  %v1174_v40 = vld [vmem:[#allocation5 + $0x144] ss:$16 sps:$4 sm:$0xff]  }
  0x46   :  { %488 = vmatpush1.bf16.msra.mxu0 %v1136_v14  ;;  %531 = vmatpush1.bf16.msra.mxu1 %v1137_v15  ;;  %v1176_v41 = vld [vmem:[#allocation5 + $0x14c] ss:$16 sps:$4 sm:$0xff]   ;;  %v1178_v42 = vld [vmem:[#allocation5 + $0x140] ss:$16 sps:$4 sm:$0xff]   ;;  %v1179_v43 = vld [vmem:[#allocation5 + $0x148] ss:$16 sps:$4 sm:$0xff]  }
  0x47   :  { %489 = vmatprep.subr.bf16.mxu0 %v1138_v16  ;;  %532 = vmatprep.subr.bf16.mxu1 %v1140_v17  ;;  %v1180_v44 = vld [vmem:[#allocation5 + $0x164] ss:$16 sps:$4 sm:$0xff]   ;;  %v1182_v45 = vld [vmem:[#allocation5 + $0x16c] ss:$16 sps:$4 sm:$0xff]   ;;  %v1184_v46 = vld [vmem:[#allocation5 + $0x160] ss:$16 sps:$4 sm:$0xff]  }
  0x48   :  { %v1185_v47 = vld [vmem:[#allocation5 + $0x168] ss:$16 sps:$4 sm:$0xff]   ;;  %v1212_v48 = vld [vmem:[#allocation2 + $0x4] ss:$8 sps:$4 sm:$0xff]   ;;  %v1190_v51 = vld [vmem:[#allocation5 + $0x180] ss:$16 sps:$4 sm:$0xff]  }
  0x49   :  { %v1186_v49 = vld [vmem:[#allocation5 + $0x184] ss:$16 sps:$4 sm:$0xff]   ;;  %v1188_v50 = vld [vmem:[#allocation5 + $0x18c] ss:$16 sps:$4 sm:$0xff]   ;;  %513 = vmatprep.mubr.bf16.mxu0 %v1212_v48  ;;  %556 = vmatprep.mubr.bf16.mxu1 %v1212_v48  ;;  %v1191_v52 = vld [vmem:[#allocation5 + $0x188] ss:$16 sps:$4 sm:$0xff]  }
  0x4a   :  { %490 = vmatpush1.bf16.msra.mxu0 %v1142_v18  ;;  %533 = vmatpush1.bf16.msra.mxu1 %v1143_v19  ;;  %v1192_v53 = vld [vmem:[#allocation5 + $0x1a4] ss:$16 sps:$4 sm:$0xff]   ;;  %v1194_v54 = vld [vmem:[#allocation5 + $0x1ac] ss:$16 sps:$4 sm:$0xff]   ;;  %v1196_v55 = vld [vmem:[#allocation5 + $0x1a0] ss:$16 sps:$4 sm:$0xff]  }
  0x4b   :  { %491 = vmatprep.subr.bf16.mxu0 %v1144_v20  ;;  %534 = vmatprep.subr.bf16.mxu1 %v1146_v21  ;;  %v1197_v56 = vld [vmem:[#allocation5 + $0x1a8] ss:$16 sps:$4 sm:$0xff]   ;;  %v1198_v57 = vld [vmem:[#allocation5 + $0x1c4] ss:$16 sps:$4 sm:$0xff]   ;;  %v1200_v58 = vld [vmem:[#allocation5 + $0x1cc] ss:$16 sps:$4 sm:$0xff]  }
  0x4c   :  { %v1202_v59 = vld [vmem:[#allocation5 + $0x1c0] ss:$16 sps:$4 sm:$0xff]   ;;  %v1203_v60 = vld [vmem:[#allocation5 + $0x1c8] ss:$16 sps:$4 sm:$0xff]   ;;  %v1204_v61 = vld [vmem:[#allocation5 + $0x1e4] ss:$16 sps:$4 sm:$0xff]  }
  0x4d   :  { %v1206_v62 = vld [vmem:[#allocation5 + $0x1ec] ss:$16 sps:$4 sm:$0xff]   ;;  %v1208_v63 = vld [vmem:[#allocation5 + $0x1e0] ss:$16 sps:$4 sm:$0xff]   ;;  %v1209_v0 = vld [vmem:[#allocation5 + $0x1e8] ss:$16 sps:$4 sm:$0xff]  }
  0x4e   :  { %492 = vmatpush1.bf16.msra.mxu0 %v1148_v22  ;;  %535 = vmatpush1.bf16.msra.mxu1 %v1149_v23  ;;  %v1213_v1 = vld [vmem:[#allocation7 + $0x40] sm:$0xff]   ;;  %v1210_v2 = vld [vmem:[#allocation2] ss:$8 sps:$4 sm:$0xff]   ;;  %v1217_v6 = vld [vmem:[#allocation7 + $0x48] sm:$0xff]   ;;  %s1348_s10 = smov [#allocation8]  }
  0x4f   :  { %493 = vmatprep.subr.bf16.mxu0 %v1150_v24  ;;  %536 = vmatprep.subr.bf16.mxu1 %v1152_v25  ;;  %v1214_v3 = vld [vmem:[#allocation7 + $0xc0] sm:$0xff]   ;;  %v1218_v7 = vld [vmem:[#allocation7 + $0xc8] sm:$0xff]   ;;  %v1221_v10 = vld [vmem:[#allocation7 + $0x50] sm:$0xff]   ;;  %s939_s11 = sshll.u32 %s1348_s10, 4  ;;  %s940_s11 = int_to_ptr.vmem [resolvable:$true] %s939_s11 }
  0x50   :  { %v1215_v4 = vld [vmem:[#allocation7] sm:$0xff]   ;;  %v1219_v8 = vld [vmem:[#allocation7 + $0x8] sm:$0xff]   ;;  %v1222_v11 = vld [vmem:[#allocation7 + $0xd0] sm:$0xff]   ;;  %p1316_p11 = scmp.lt.s32.totalorder %s940_s11, %s940_s11 }
  0x51   :  { %v1216_v5 = vld [vmem:[#allocation7 + $0x80] sm:$0xff]   ;;  %v1220_v9 = vld [vmem:[#allocation7 + $0x88] sm:$0xff]   ;;  %v1223_v12 = vld [vmem:[#allocation7 + $0x10] sm:$0xff]  }
  0x52   :  { %494 = vmatpush1.bf16.msra.mxu0 %v1154_v26  ;;  %537 = vmatpush1.bf16.msra.mxu1 %v1155_v27  ;;  %v1224_v13 = vld [vmem:[#allocation7 + $0x90] sm:$0xff]   ;;  %v1225_v14 = vld [vmem:[#allocation7 + $0x58] sm:$0xff]   ;;  %v1229_v18 = vld [vmem:[#allocation7 + $0x60] sm:$0xff]  }
  0x53   :  { %495 = vmatprep.subr.bf16.mxu0 %v1156_v28  ;;  %538 = vmatprep.subr.bf16.mxu1 %v1158_v29  ;;  %v1226_v15 = vld [vmem:[#allocation7 + $0xd8] sm:$0xff]   ;;  %v1230_v19 = vld [vmem:[#allocation7 + $0xe0] sm:$0xff]   ;;  %v1233_v22 = vld [vmem:[#allocation7 + $0x68] sm:$0xff]  }
  0x54   :  { %v1227_v16 = vld [vmem:[#allocation7 + $0x18] sm:$0xff]   ;;  %v1231_v20 = vld [vmem:[#allocation7 + $0x20] sm:$0xff]   ;;  %v1234_v23 = vld [vmem:[#allocation7 + $0xe8] sm:$0xff]  }
  0x55   :  { %v1228_v17 = vld [vmem:[#allocation7 + $0x98] sm:$0xff]   ;;  %v1232_v21 = vld [vmem:[#allocation7 + $0xa0] sm:$0xff]   ;;  %v1235_v24 = vld [vmem:[#allocation7 + $0x28] sm:$0xff]  }
  0x56   :  { %496 = vmatpush1.bf16.msra.mxu0 %v1160_v30  ;;  %539 = vmatpush1.bf16.msra.mxu1 %v1161_v31  ;;  %v1236_v25 = vld [vmem:[#allocation7 + $0xa8] sm:$0xff]   ;;  %v1237_v26 = vld [vmem:[#allocation7 + $0x70] sm:$0xff]   ;;  %v1241_v30 = vld [vmem:[#allocation7 + $0x78] sm:$0xff]  }
  0x57   :  { %497 = vmatprep.subr.bf16.mxu0 %v1162_v32  ;;  %540 = vmatprep.subr.bf16.mxu1 %v1164_v33  ;;  %v1238_v27 = vld [vmem:[#allocation7 + $0xf0] sm:$0xff]   ;;  %v1242_v31 = vld [vmem:[#allocation7 + $0xf8] sm:$0xff]  }
  0x58   :  { %v1239_v28 = vld [vmem:[#allocation7 + $0x30] sm:$0xff]   ;;  %v1243_v32 = vld [vmem:[#allocation7 + $0x38] sm:$0xff]  }
  0x59   :  { %v1240_v29 = vld [vmem:[#allocation7 + $0xb0] sm:$0xff]   ;;  %v1244_v33 = vld [vmem:[#allocation7 + $0xb8] sm:$0xff]  }
  0x5a   :  { %498 = vmatpush1.bf16.msra.mxu0 %v1166_v34  ;;  %541 = vmatpush1.bf16.msra.mxu1 %v1167_v35  ;;  %v131_v34 = vlaneseq }
  0x5b   :  { %499 = vmatprep.subr.bf16.mxu0 %v1168_v36  ;;  %542 = vmatprep.subr.bf16.mxu1 %v1170_v37 }
  0x5c   :  { %v132_v35 = vshrl.u32 %v131_v34, 7 }
  0x5e   :  { %500 = vmatpush1.bf16.msra.mxu0 %v1172_v38  ;;  %543 = vmatpush1.bf16.msra.mxu1 %v1173_v39  ;;  %v133_v36 = vsub.s32 0, %v132_v35  ;;  %v141_v37 = vsub.s32 2, %v132_v35  ;;  %v129_v38 = vld [vmem:[%s1441_s2] sm:$0xf]  ;;  %v137_v39 = vsub.s32 1, %v132_v35 }
  0x5f   :  { %501 = vmatprep.subr.bf16.mxu0 %v1174_v40  ;;  %544 = vmatprep.subr.bf16.mxu1 %v1176_v41  ;;  %v145_v40 = vsub.s32 3, %v132_v35 }
  0x60   :  { %v134_v41 = vrot.slane %v129_v38, %v133_v36 }
  0x62   :  { %502 = vmatpush1.bf16.msra.mxu0 %v1178_v42  ;;  %545 = vmatpush1.bf16.msra.mxu1 %v1179_v43  ;;  %v142_v42 = vrot.slane %v129_v38, %v141_v37  ;;  %v138_v43 = vrot.slane %v129_v38, %v137_v39 }
  0x63   :  { %503 = vmatprep.subr.bf16.mxu0 %v1180_v44  ;;  %546 = vmatprep.subr.bf16.mxu1 %v1182_v45  ;;  %v146_v44 = vrot.slane %v129_v38, %v145_v40 }
  0x66   :  { %504 = vmatpush1.bf16.msra.mxu0 %v1184_v46  ;;  %547 = vmatpush1.bf16.msra.mxu1 %v1185_v47 }
  0x67   :  { %505 = vmatprep.subr.bf16.mxu0 %v1186_v49  ;;  %548 = vmatprep.subr.bf16.mxu1 %v1188_v50 }
  0x6a   :  { %506 = vmatpush1.bf16.msra.mxu0 %v1190_v51  ;;  %549 = vmatpush1.bf16.msra.mxu1 %v1191_v52 }
  0x6b   :  { %507 = vmatprep.subr.bf16.mxu0 %v1192_v53  ;;  %550 = vmatprep.subr.bf16.mxu1 %v1194_v54 }
  0x6e   :  { %508 = vmatpush1.bf16.msra.mxu0 %v1196_v55  ;;  %551 = vmatpush1.bf16.msra.mxu1 %v1197_v56 }
  0x6f   :  { %509 = vmatprep.subr.bf16.mxu0 %v1198_v57  ;;  %552 = vmatprep.subr.bf16.mxu1 %v1200_v58 }
  0x72   :  { %510 = vmatpush1.bf16.msra.mxu0 %v1202_v59  ;;  %553 = vmatpush1.bf16.msra.mxu1 %v1203_v60 }
  0x73   :  { %511 = vmatprep.subr.bf16.mxu0 %v1204_v61  ;;  %554 = vmatprep.subr.bf16.mxu1 %v1206_v62 }
  0x76   :  { %512 = vmatpush1.bf16.msra.mxu0 %v1208_v63  ;;  %555 = vmatpush1.bf16.msra.mxu1 %v1209_v0 }
  0x77   :  { %1060 = vmatprep.subr.bf16.mxu0 %v1213_v1  ;;  %1082 = vmatprep.subr.bf16.mxu1 %v1214_v3 }
  0x79   :  { %514 = vmatmul.mubr.bf16.vlgmr.msra.gmra.mrb[0].mxu0 %v1210_v2  ;;  %557 = vmatmul.mubr.bf16.vlgmr.msra.gmra.mrb[0].mxu1 %v1210_v2 }
  0x7a   :  { %1061 = vmatpush3.bf16.msra.mxu0 %v1215_v4  ;;  %1083 = vmatpush3.bf16.msra.mxu1 %v1216_v5 }
  0x7b   :  { %1062 = vmatprep.subr.bf16.mxu0 %v1217_v6  ;;  %1084 = vmatprep.subr.bf16.mxu1 %v1218_v7 }
  0x7e   :  { %1063 = vmatpush3.bf16.msra.mxu0 %v1219_v8  ;;  %1085 = vmatpush3.bf16.msra.mxu1 %v1220_v9 }
  0x7f   :  { %1064 = vmatprep.subr.bf16.mxu0 %v1221_v10  ;;  %1086 = vmatprep.subr.bf16.mxu1 %v1222_v11  ;;  %v1018_v11 = vld [vmem:[%s1443_s4] ss:$0 sm:$0xff]  ;;  %s1311_s4 = scalar_lea.vmem %s940_s11, 128 }
  0x80   :  { %p1312_p10 = scmp.ne.s32.totalorder %s940_s11, %s1311_s4  ;;  %p1317_p12 = scmp.lt.s32.totalorder %s1311_s4, %s1311_s4 }
  0x82   :  { %1065 = vmatpush3.bf16.msra.mxu0 %v1223_v12  ;;  %1087 = vmatpush3.bf16.msra.mxu1 %v1224_v13  ;;  %p1318_p13 = por %p1317_p12, %p1316_p11 }
  0x83   :  { %1066 = vmatprep.subr.bf16.mxu0 %v1225_v14  ;;  %1088 = vmatprep.subr.bf16.mxu1 %v1226_v15 }
  0x84   :  { %p1319_p0 = pnand %p1318_p13, %p1312_p10 }
  0x86   :  { %1067 = vmatpush3.bf16.msra.mxu0 %v1227_v16  ;;  %1089 = vmatpush3.bf16.msra.mxu1 %v1228_v17 }
  0x87   :  { %1068 = vmatprep.subr.bf16.mxu0 %v1229_v18  ;;  %1090 = vmatprep.subr.bf16.mxu1 %v1230_v19 }
  0x8a   :  { %1069 = vmatpush3.bf16.msra.mxu0 %v1231_v20  ;;  %1091 = vmatpush3.bf16.msra.mxu1 %v1232_v21 }
  0x8b   :  { %1070 = vmatprep.subr.bf16.mxu0 %v1233_v22  ;;  %1092 = vmatprep.subr.bf16.mxu1 %v1234_v23 }
  0x8e   :  { %1071 = vmatpush3.bf16.msra.mxu0 %v1235_v24  ;;  %1093 = vmatpush3.bf16.msra.mxu1 %v1236_v25 }
  0x8f   :  { %1072 = vmatprep.subr.bf16.mxu0 %v1237_v26  ;;  %1094 = vmatprep.subr.bf16.mxu1 %v1238_v27 }
  0x92   :  { %1073 = vmatpush3.bf16.msra.mxu0 %v1239_v28  ;;  %1095 = vmatpush3.bf16.msra.mxu1 %v1240_v29 }
  0x93   :  { %1074 = vmatprep.subr.bf16.mxu0 %v1241_v30  ;;  %1096 = vmatprep.subr.bf16.mxu1 %v1242_v31 }
  0x96   :  { %1075 = vmatpush3.bf16.msra.mxu0 %v1243_v32  ;;  %1097 = vmatpush3.bf16.msra.mxu1 %v1244_v33 }
 0x14c   :  { %v515_v45 = vpop.f32.mrb[0].mxu0  ;;  %v558_v46 = vpop.f32.mrb[0].mxu1 }
 0x14d   :  { %v516_v47 = vadd.f32 %v515_v45, %v134_v41  ;;  %v559_v48 = vadd.f32 %v558_v46, %v142_v42  ;;  %v517_v49 = vpop.f32.mrb[1].mxu0  ;;  %v560_v50 = vpop.f32.mrb[1].mxu1 }
 0x14e   :  { %v518_v51 = vadd.f32 %v517_v49, %v138_v43  ;;  %v561_v52 = vadd.f32 %v560_v50, %v146_v44  ;;  %v519_v53 = vpop.f32.mrb[2].mxu0  ;;  %v562_v54 = vpop.f32.mrb[2].mxu1 }
 0x14f   :  { %v569_v55 = vmax.f32 %v559_v48, 0.0  ;;  %v520_v56 = vadd.f32 %v519_v53, %v134_v41  ;;  %v563_v57 = vadd.f32 %v562_v54, %v142_v42  ;;  %v521_v58 = vpop.f32.mrb[3].mxu0  ;;  %v564_v59 = vpop.f32.mrb[3].mxu1  ;;  %v567_v63 = vmax.f32 %v516_v47, 0.0 }
 0x150   :  { %v570_v60 = vmax.f32 %v561_v52, 0.0  ;;  %v522_v61 = vadd.f32 %v521_v58, %v138_v43  ;;  %v565_v62 = vadd.f32 %v564_v59, %v146_v44  ;;  %v568_v2 = vmax.f32 %v518_v51, 0.0 }
 0x151   :  { %v571_v0 = vmax.f32 %v520_v56, 0.0  ;;  %v573_v1 = vmax.f32 %v563_v57, 0.0 }
 0x152   :  { %v572_v3 = vmax.f32 %v522_v61, 0.0  ;;  %v574_v4 = vmax.f32 %v565_v62, 0.0 }
 0x153   :  { %v575_v5 = vpack.c.bf16 %v571_v0, %v567_v63  ;;  %v577_v6 = vpack.c.bf16 %v573_v1, %v569_v55 }
 0x154   :  { %v576_v7 = vpack.c.bf16 %v572_v3, %v568_v2  ;;  %v578_v8 = vpack.c.bf16 %v574_v4, %v570_v60 }
 0x156   :  { %874 = vmatprep.mubr.bf16.mxu0 %v576_v7  ;;  %915 = vmatprep.mubr.bf16.mxu1 %v578_v8 }
 0x157   :  { %875 = vmatmul.mubr.bf16.vlgmr.msra.gmra.mrb[4].mxu0 %v575_v5  ;;  %916 = vmatmul.mubr.bf16.vlgmr.msra.gmra.mrb[4].mxu1 %v577_v6 }
 0x22a   :  { %v1076_v9 = vpop.f32.mrb[4].mxu0  ;;  %v1098_v10 = vpop.f32.mrb[4].mxu1 }
 0x22b   :  { %v1077_v12 = vpop.f32.mrb[5].mxu0  ;;  %v1099_v13 = vpop.f32.mrb[5].mxu1 }
 0x22c   :  { %v1078_v14 = vadd.f32 %v1077_v12, %v1076_v9  ;;  %v1100_v15 = vadd.f32 %v1099_v13, %v1098_v10  ;;  %v1079_v16 = vpop.f32.mrb[6].mxu0  ;;  %v1101_v17 = vpop.f32.mrb[6].mxu1 }
 0x22d   :  { %v1080_v18 = vpop.f32.mrb[7].mxu0  ;;  %v1102_v19 = vpop.f32.mrb[7].mxu1 }
 0x22e   :  { %v877_v20 = vadd.f32 %v1078_v14, %v1018_v11  ;;  %v1081_v21 = vadd.f32 %v1080_v18, %v1079_v16  ;;  %v1103_v22 = vadd.f32 %v1102_v19, %v1101_v17 }
 0x230   :  { %v918_v23 = vadd.f32 %v1100_v15, %v877_v20  ;;  %v880_v24 = vadd.f32 %v1081_v21, %v1018_v11 }
 0x232   :  { %v921_v25 = vadd.f32 %v1103_v22, %v880_v24 }
 0x234   :  { %v1058_v26 = vpack.c.bf16 %v921_v25, %v918_v23 }
 0x236   :  { %1059 = vst [vmem:[#allocation8] sm:$0xff] %v1058_v26  }
 0x237   :  { %1322 = shalt.err (!%p1319_p0)
}
 0x238   :  { %s1323_s14 = scalar_lea.hbm %s1444_s5, 128 }
 0x239   :  { %p1324_p1 = scmp.ne.s32.totalorder %s1444_s5, %s1323_s14  ;;  %p1327_p2 = scmp.lt.u32.totalorder %s1323_s14, %s1444_s5 }
 0x23b   :  { %p1329_p3 = pnand %p1327_p2, %p1324_p1 }
 0x23d   :  { %1332 = shalt.err (!%p1329_p3)
}
 0x23e   :  { %945 = dma.vmem_to_hbm [thread:$0]  %s940_s11, 128, %s1444_s5, [#allocation4], %s1346_s0, %s1346_s0, %s1347_s30  }
 0x23f   :  { %1337 = dma.done.wait [#allocation4], 128  }
 0x240   :  { %1338 = vsyncadd [#allocation4], 4294967168 }
 0x241   :  { %949 = vsyncpa [#allocation3], 1 }
 0x242   :  { %950 = vsyncpa [#allocation6], 1 }
 0x243   :  { %951 = vsyncpa [#allocation4], 1 }

// kernel: tpu_custom_call.1
= control target key start
LH: loop header
LB: loop body
LE: loop exit
PB: predicated region body
PF: predicated region fallthrough
CT: control target
= control target key end

     0   :  { %10 = vsyncpa [#allocation3], 0  ;;  %s1439_s0 = inlined_call_operand.hbm [shape: bf16[16,256], index: 0, kind: input, shape index: {}]   ;;  %s1440_s1 = inlined_call_operand.hbm [shape: bf16[256,512], index: 1, kind: input, shape index: {}]   ;;  %s1441_s2 = inlined_call_operand.vmem [shape: f32[1,512], index: 2, kind: input, shape index: {}]   ;;  %s1442_s3 = inlined_call_operand.hbm [shape: bf16[512,128], index: 3, kind: input, shape index: {}]   ;;  %s1443_s4 = inlined_call_operand.vmem [shape: f32[1,128], index: 4, kind: input, shape index: {}]   ;;  %s1444_s5 = inlined_call_operand.hbm [shape: bf16[16,128], index: 5, kind: output, shape index: {}]  }
   0x1   :  { %11 = vsyncpa [#allocation6], 0 }
   0x2   :  { %12 = vsyncpa [#allocation4], 0  ;;  %s1339_s18 = smov [#allocation5]   ;;  %s1245_s22 = scalar_lea.hbm %s1440_s1, 8192 }
   0x3   :  { %s30_s19 = sshll.u32 %s1339_s18, 4  ;;  %p1246_p0 = scmp.ne.s32.totalorder %s1440_s1, %s1245_s22  ;;  %s31_s19 = int_to_ptr.vmem [resolvable:$true] %s30_s19 }
   0x4   :  { %p1249_p1 = scmp.lt.u32.totalorder %s1245_s22, %s1440_s1 }
   0x6   :  { %p1251_p2 = pnand %p1249_p1, %p1246_p0 }
   0x8   :  { %1254 = shalt.err (!%p1251_p2)
}
   0x9   :  { %s1255_s27 = scalar_lea.vmem %s31_s19, 8192  ;;  %p1260_p4 = scmp.lt.s32.totalorder %s31_s19, %s31_s19 }
   0xa   :  { %p1256_p3 = scmp.ne.s32.totalorder %s31_s19, %s1255_s27  ;;  %p1261_p5 = scmp.lt.s32.totalorder %s1255_s27, %s1255_s27 }
   0xc   :  { %p1262_p6 = por %p1261_p5, %p1260_p4 }
   0xe   :  { %p1263_p7 = pnand %p1262_p6, %p1256_p3 }
  0x10   :  { %1266 = shalt.err (!%p1263_p7)
}
  0x11   :  { %s1340_s28 = smov 256   ;;  %s1341_s29 = smov 16  }
  0x12   :  { %36 = dma.hbm_to_vmem [thread:$0]  %s1440_s1, 8192, %s31_s19, [#allocation6], %s1340_s28, %s1340_s28, %s1341_s29  }
  0x13   :  { %s1342_s7 = smov [#allocation2]   ;;  %s1267_s11 = scalar_lea.hbm %s1439_s0, 256 }
  0x14   :  { %s18_s8 = sshll.u32 %s1342_s7, 4  ;;  %p1268_p8 = scmp.ne.s32.totalorder %s1439_s0, %s1267_s11  ;;  %s19_s8 = int_to_ptr.vmem [resolvable:$true] %s18_s8 }
  0x15   :  { %p1271_p9 = scmp.lt.u32.totalorder %s1267_s11, %s1439_s0 }
  0x17   :  { %p1273_p10 = pnand %p1271_p9, %p1268_p8 }
  0x19   :  { %1276 = shalt.err (!%p1273_p10)
}
  0x1a   :  { %s1277_s16 = scalar_lea.vmem %s19_s8, 256  ;;  %p1282_p12 = scmp.lt.s32.totalorder %s19_s8, %s19_s8 }
  0x1b   :  { %p1278_p11 = scmp.ne.s32.totalorder %s19_s8, %s1277_s16  ;;  %p1283_p13 = scmp.lt.s32.totalorder %s1277_s16, %s1277_s16 }
  0x1d   :  { %p1284_p0 = por %p1283_p13, %p1282_p12 }
  0x1f   :  { %p1285_p1 = pnand %p1284_p0, %p1278_p11 }
  0x21   :  { %1288 = shalt.err (!%p1285_p1)
}
  0x22   :  { %s1343_s1 = smov 128   ;;  %s1344_s17 = smov 8  }
  0x23   :  { %24 = dma.hbm_to_vmem [thread:$0]  %s1439_s0, 256, %s19_s8, [#allocation3], %s1343_s1, %s1343_s1, %s1344_s17  }
  0x24   :  { %s1345_s20 = smov [#allocation7]   ;;  %s1289_s24 = scalar_lea.hbm %s1442_s3, 4096 }
  0x25   :  { %s44_s21 = sshll.u32 %s1345_s20, 4  ;;  %p1290_p2 = scmp.ne.s32.totalorder %s1442_s3, %s1289_s24  ;;  %s45_s21 = int_to_ptr.vmem [resolvable:$true] %s44_s21 }
  0x26   :  { %p1293_p3 = scmp.lt.u32.totalorder %s1289_s24, %s1442_s3 }
  0x28   :  { %p1295_p4 = pnand %p1293_p3, %p1290_p2 }
  0x2a   :  { %1298 = shalt.err (!%p1295_p4)
}
  0x2b   :  { %s1299_s29 = scalar_lea.vmem %s45_s21, 4096  ;;  %p1304_p6 = scmp.lt.s32.totalorder %s45_s21, %s45_s21 }
  0x2c   :  { %p1300_p5 = scmp.ne.s32.totalorder %s45_s21, %s1299_s29  ;;  %p1305_p7 = scmp.lt.s32.totalorder %s1299_s29, %s1299_s29 }
  0x2e   :  { %p1306_p8 = por %p1305_p7, %p1304_p6 }
  0x30   :  { %p1307_p9 = pnand %p1306_p8, %p1300_p5 }
  0x32   :  { %1310 = shalt.err (!%p1307_p9)
}
  0x33   :  { %s1346_s0 = smov 64   ;;  %s1347_s30 = smov 4  }
  0x34   :  { %50 = dma.hbm_to_vmem [thread:$0]  %s1442_s3, 4096, %s45_s21, [#allocation6], %s1346_s0, %s1346_s0, %s1347_s30  }
  0x35   :  { %1333 = dma.done.wait [#allocation3], 256  }
  0x36   :  { %1334 = vsyncadd [#allocation3], 4294967040 }
  0x37   :  { %1335 = dma.done.wait [#allocation6], 12288  }
  0x38   :  { %1336 = vsyncadd [#allocation6], 4294955008  ;;  %v1114_v0 = vld [vmem:[#allocation5 + $0x4] ss:$16 sps:$4 sm:$0xff]   ;;  %v1116_v1 = vld [vmem:[#allocation5 + $0xc] ss:$16 sps:$4 sm:$0xff]  }
  0x39   :  { %481 = vmatprep.subr.bf16.mxu0 %v1114_v0  ;;  %v1118_v2 = vld [vmem:[#allocation5] ss:$16 sps:$4 sm:$0xff]   ;;  %v1119_v3 = vld [vmem:[#allocation5 + $0x8] ss:$16 sps:$4 sm:$0xff]   ;;  %524 = vmatprep.subr.bf16.mxu1 %v1116_v1  ;;  %v1120_v4 = vld [vmem:[#allocation5 + $0x24] ss:$16 sps:$4 sm:$0xff]  }
  0x3a   :  { %482 = vmatpush1.bf16.msra.mxu0 %v1118_v2  ;;  %525 = vmatpush1.bf16.msra.mxu1 %v1119_v3  ;;  %v1122_v5 = vld [vmem:[#allocation5 + $0x2c] ss:$16 sps:$4 sm:$0xff]   ;;  %v1124_v6 = vld [vmem:[#allocation5 + $0x20] ss:$16 sps:$4 sm:$0xff]   ;;  %v1125_v7 = vld [vmem:[#allocation5 + $0x28] ss:$16 sps:$4 sm:$0xff]  }
  0x3b   :  { %483 = vmatprep.subr.bf16.mxu0 %v1120_v4  ;;  %526 = vmatprep.subr.bf16.mxu1 %v1122_v5  ;;  %v1126_v8 = vld [vmem:[#allocation5 + $0x44] ss:$16 sps:$4 sm:$0xff]   ;;  %v1128_v9 = vld [vmem:[#allocation5 + $0x4c] ss:$16 sps:$4 sm:$0xff]   ;;  %v1130_v10 = vld [vmem:[#allocation5 + $0x40] ss:$16 sps:$4 sm:$0xff]  }
  0x3c   :  { %v1131_v11 = vld [vmem:[#allocation5 + $0x48] ss:$16 sps:$4 sm:$0xff]   ;;  %v1132_v12 = vld [vmem:[#allocation5 + $0x64] ss:$16 sps:$4 sm:$0xff]   ;;  %v1134_v13 = vld [vmem:[#allocation5 + $0x6c] ss:$16 sps:$4 sm:$0xff]  }
  0x3d   :  { %v1136_v14 = vld [vmem:[#allocation5 + $0x60] ss:$16 sps:$4 sm:$0xff]   ;;  %v1137_v15 = vld [vmem:[#allocation5 + $0x68] ss:$16 sps:$4 sm:$0xff]   ;;  %v1138_v16 = vld [vmem:[#allocation5 + $0x84] ss:$16 sps:$4 sm:$0xff]  }
  0x3e   :  { %484 = vmatpush1.bf16.msra.mxu0 %v1124_v6  ;;  %527 = vmatpush1.bf16.msra.mxu1 %v1125_v7  ;;  %v1140_v17 = vld [vmem:[#allocation5 + $0x8c] ss:$16 sps:$4 sm:$0xff]   ;;  %v1142_v18 = vld [vmem:[#allocation5 + $0x80] ss:$16 sps:$4 sm:$0xff]   ;;  %v1143_v19 = vld [vmem:[#allocation5 + $0x88] ss:$16 sps:$4 sm:$0xff]  }
  0x3f   :  { %485 = vmatprep.subr.bf16.mxu0 %v1126_v8  ;;  %528 = vmatprep.subr.bf16.mxu1 %v1128_v9  ;;  %v1144_v20 = vld [vmem:[#allocation5 + $0xa4] ss:$16 sps:$4 sm:$0xff]   ;;  %v1146_v21 = vld [vmem:[#allocation5 + $0xac] ss:$16 sps:$4 sm:$0xff]   ;;  %v1148_v22 = vld [vmem:[#allocation5 + $0xa0] ss:$16 sps:$4 sm:$0xff]  }
  0x40   :  { %v1149_v23 = vld [vmem:[#allocation5 + $0xa8] ss:$16 sps:$4 sm:$0xff]   ;;  %v1150_v24 = vld [vmem:[#allocation5 + $0xc4] ss:$16 sps:$4 sm:$0xff]   ;;  %v1152_v25 = vld [vmem:[#allocation5 + $0xcc] ss:$16 sps:$4 sm:$0xff]  }
  0x41   :  { %v1154_v26 = vld [vmem:[#allocation5 + $0xc0] ss:$16 sps:$4 sm:$0xff]   ;;  %v1155_v27 = vld [vmem:[#allocation5 + $0xc8] ss:$16 sps:$4 sm:$0xff]   ;;  %v1156_v28 = vld [vmem:[#allocation5 + $0xe4] ss:$16 sps:$4 sm:$0xff]  }
  0x42   :  { %486 = vmatpush1.bf16.msra.mxu0 %v1130_v10  ;;  %529 = vmatpush1.bf16.msra.mxu1 %v1131_v11  ;;  %v1158_v29 = vld [vmem:[#allocation5 + $0xec] ss:$16 sps:$4 sm:$0xff]   ;;  %v1160_v30 = vld [vmem:[#allocation5 + $0xe0] ss:$16 sps:$4 sm:$0xff]   ;;  %v1161_v31 = vld [vmem:[#allocation5 + $0xe8] ss:$16 sps:$4 sm:$0xff]  }
  0x43   :  { %487 = vmatprep.subr.bf16.mxu0 %v1132_v12  ;;  %530 = vmatprep.subr.bf16.mxu1 %v1134_v13  ;;  %v1162_v32 = vld [vmem:[#allocation5 + $0x104] ss:$16 sps:$4 sm:$0xff]   ;;  %v1164_v33 = vld [vmem:[#allocation5 + $0x10c] ss:$16 sps:$4 sm:$0xff]   ;;  %v1166_v34 = vld [vmem:[#allocation5 + $0x100] ss:$16 sps:$4 sm:$0xff]  }
  0x44   :  { %v1167_v35 = vld [vmem:[#allocation5 + $0x108] ss:$16 sps:$4 sm:$0xff]   ;;  %v1168_v36 = vld [vmem:[#allocation5 + $0x124] ss:$16 sps:$4 sm:$0xff]   ;;  %v1170_v37 = vld [vmem:[#allocation5 + $0x12c] ss:$16 sps:$4 sm:$0xff]  }
  0x45   :  { %v1172_v38 = vld [vmem:[#allocation5 + $0x120] ss:$16 sps:$4 sm:$0xff]   ;;  %v1173_v39 = vld [vmem:[#allocation5 + $0x128] ss:$16 sps:$4 sm:$0xff]   ;;  %v1174_v40 = vld [vmem:[#allocation5 + $0x144] ss:$16 sps:$4 sm:$0xff]  }
  0x46   :  { %488 = vmatpush1.bf16.msra.mxu0 %v1136_v14  ;;  %531 = vmatpush1.bf16.msra.mxu1 %v1137_v15  ;;  %v1176_v41 = vld [vmem:[#allocation5 + $0x14c] ss:$16 sps:$4 sm:$0xff]   ;;  %v1178_v42 = vld [vmem:[#allocation5 + $0x140] ss:$16 sps:$4 sm:$0xff]   ;;  %v1179_v43 = vld [vmem:[#allocation5 + $0x148] ss:$16 sps:$4 sm:$0xff]  }
  0x47   :  { %489 = vmatprep.subr.bf16.mxu0 %v1138_v16  ;;  %532 = vmatprep.subr.bf16.mxu1 %v1140_v17  ;;  %v1180_v44 = vld [vmem:[#allocation5 + $0x164] ss:$16 sps:$4 sm:$0xff]   ;;  %v1182_v45 = vld [vmem:[#allocation5 + $0x16c] ss:$16 sps:$4 sm:$0xff]   ;;  %v1184_v46 = vld [vmem:[#allocation5 + $0x160] ss:$16 sps:$4 sm:$0xff]  }
  0x48   :  { %v1185_v47 = vld [vmem:[#allocation5 + $0x168] ss:$16 sps:$4 sm:$0xff]   ;;  %v1212_v48 = vld [vmem:[#allocation2 + $0x4] ss:$8 sps:$4 sm:$0xff]   ;;  %v1190_v51 = vld [vmem:[#allocation5 + $0x180] ss:$16 sps:$4 sm:$0xff]  }
  0x49   :  { %v1186_v49 = vld [vmem:[#allocation5 + $0x184] ss:$16 sps:$4 sm:$0xff]   ;;  %v1188_v50 = vld [vmem:[#allocation5 + $0x18c] ss:$16 sps:$4 sm:$0xff]   ;;  %513 = vmatprep.mubr.bf16.mxu0 %v1212_v48  ;;  %556 = vmatprep.mubr.bf16.mxu1 %v1212_v48  ;;  %v1191_v52 = vld [vmem:[#allocation5 + $0x188] ss:$16 sps:$4 sm:$0xff]  }
  0x4a   :  { %490 = vmatpush1.bf16.msra.mxu0 %v1142_v18  ;;  %533 = vmatpush1.bf16.msra.mxu1 %v1143_v19  ;;  %v1192_v53 = vld [vmem:[#allocation5 + $0x1a4] ss:$16 sps:$4 sm:$0xff]   ;;  %v1194_v54 = vld [vmem:[#allocation5 + $0x1ac] ss:$16 sps:$4 sm:$0xff]   ;;  %v1196_v55 = vld [vmem:[#allocation5 + $0x1a0] ss:$16 sps:$4 sm:$0xff]  }
  0x4b   :  { %491 = vmatprep.subr.bf16.mxu0 %v1144_v20  ;;  %534 = vmatprep.subr.bf16.mxu1 %v1146_v21  ;;  %v1197_v56 = vld [vmem:[#allocation5 + $0x1a8] ss:$16 sps:$4 sm:$0xff]   ;;  %v1198_v57 = vld [vmem:[#allocation5 + $0x1c4] ss:$16 sps:$4 sm:$0xff]   ;;  %v1200_v58 = vld [vmem:[#allocation5 + $0x1cc] ss:$16 sps:$4 sm:$0xff]  }
  0x4c   :  { %v1202_v59 = vld [vmem:[#allocation5 + $0x1c0] ss:$16 sps:$4 sm:$0xff]   ;;  %v1203_v60 = vld [vmem:[#allocation5 + $0x1c8] ss:$16 sps:$4 sm:$0xff]   ;;  %v1204_v61 = vld [vmem:[#allocation5 + $0x1e4] ss:$16 sps:$4 sm:$0xff]  }
  0x4d   :  { %v1206_v62 = vld [vmem:[#allocation5 + $0x1ec] ss:$16 sps:$4 sm:$0xff]   ;;  %v1208_v63 = vld [vmem:[#allocation5 + $0x1e0] ss:$16 sps:$4 sm:$0xff]   ;;  %v1209_v0 = vld [vmem:[#allocation5 + $0x1e8] ss:$16 sps:$4 sm:$0xff]  }
  0x4e   :  { %492 = vmatpush1.bf16.msra.mxu0 %v1148_v22  ;;  %535 = vmatpush1.bf16.msra.mxu1 %v1149_v23  ;;  %v1213_v1 = vld [vmem:[#allocation7 + $0x40] sm:$0xff]   ;;  %v1210_v2 = vld [vmem:[#allocation2] ss:$8 sps:$4 sm:$0xff]   ;;  %v1217_v6 = vld [vmem:[#allocation7 + $0x48] sm:$0xff]   ;;  %s1348_s10 = smov [#allocation8]  }
  0x4f   :  { %493 = vmatprep.subr.bf16.mxu0 %v1150_v24  ;;  %536 = vmatprep.subr.bf16.mxu1 %v1152_v25  ;;  %v1214_v3 = vld [vmem:[#allocation7 + $0xc0] sm:$0xff]   ;;  %v1218_v7 = vld [vmem:[#allocation7 + $0xc8] sm:$0xff]   ;;  %v1221_v10 = vld [vmem:[#allocation7 + $0x50] sm:$0xff]   ;;  %s939_s11 = sshll.u32 %s1348_s10, 4  ;;  %s940_s11 = int_to_ptr.vmem [resolvable:$true] %s939_s11 }
  0x50   :  { %v1215_v4 = vld [vmem:[#allocation7] sm:$0xff]   ;;  %v1219_v8 = vld [vmem:[#allocation7 + $0x8] sm:$0xff]   ;;  %v1222_v11 = vld [vmem:[#allocation7 + $0xd0] sm:$0xff]   ;;  %p1316_p11 = scmp.lt.s32.totalorder %s940_s11, %s940_s11 }
  0x51   :  { %v1216_v5 = vld [vmem:[#allocation7 + $0x80] sm:$0xff]   ;;  %v1220_v9 = vld [vmem:[#allocation7 + $0x88] sm:$0xff]   ;;  %v1223_v12 = vld [vmem:[#allocation7 + $0x10] sm:$0xff]  }
  0x52   :  { %494 = vmatpush1.bf16.msra.mxu0 %v1154_v26  ;;  %537 = vmatpush1.bf16.msra.mxu1 %v1155_v27  ;;  %v1224_v13 = vld [vmem:[#allocation7 + $0x90] sm:$0xff]   ;;  %v1225_v14 = vld [vmem:[#allocation7 + $0x58] sm:$0xff]   ;;  %v1229_v18 = vld [vmem:[#allocation7 + $0x60] sm:$0xff]  }
  0x53   :  { %495 = vmatprep.subr.bf16.mxu0 %v1156_v28  ;;  %538 = vmatprep.subr.bf16.mxu1 %v1158_v29  ;;  %v1226_v15 = vld [vmem:[#allocation7 + $0xd8] sm:$0xff]   ;;  %v1230_v19 = vld [vmem:[#allocation7 + $0xe0] sm:$0xff]   ;;  %v1233_v22 = vld [vmem:[#allocation7 + $0x68] sm:$0xff]  }
  0x54   :  { %v1227_v16 = vld [vmem:[#allocation7 + $0x18] sm:$0xff]   ;;  %v1231_v20 = vld [vmem:[#allocation7 + $0x20] sm:$0xff]   ;;  %v1234_v23 = vld [vmem:[#allocation7 + $0xe8] sm:$0xff]  }
  0x55   :  { %v1228_v17 = vld [vmem:[#allocation7 + $0x98] sm:$0xff]   ;;  %v1232_v21 = vld [vmem:[#allocation7 + $0xa0] sm:$0xff]   ;;  %v1235_v24 = vld [vmem:[#allocation7 + $0x28] sm:$0xff]  }
  0x56   :  { %496 = vmatpush1.bf16.msra.mxu0 %v1160_v30  ;;  %539 = vmatpush1.bf16.msra.mxu1 %v1161_v31  ;;  %v1236_v25 = vld [vmem:[#allocation7 + $0xa8] sm:$0xff]   ;;  %v1237_v26 = vld [vmem:[#allocation7 + $0x70] sm:$0xff]   ;;  %v1241_v30 = vld [vmem:[#allocation7 + $0x78] sm:$0xff]  }
  0x57   :  { %497 = vmatprep.subr.bf16.mxu0 %v1162_v32  ;;  %540 = vmatprep.subr.bf16.mxu1 %v1164_v33  ;;  %v1238_v27 = vld [vmem:[#allocation7 + $0xf0] sm:$0xff]   ;;  %v1242_v31 = vld [vmem:[#allocation7 + $0xf8] sm:$0xff]  }
  0x58   :  { %v1239_v28 = vld [vmem:[#allocation7 + $0x30] sm:$0xff]   ;;  %v1243_v32 = vld [vmem:[#allocation7 + $0x38] sm:$0xff]  }
  0x59   :  { %v1240_v29 = vld [vmem:[#allocation7 + $0xb0] sm:$0xff]   ;;  %v1244_v33 = vld [vmem:[#allocation7 + $0xb8] sm:$0xff]  }
  0x5a   :  { %498 = vmatpush1.bf16.msra.mxu0 %v1166_v34  ;;  %541 = vmatpush1.bf16.msra.mxu1 %v1167_v35  ;;  %v131_v34 = vlaneseq }
  0x5b   :  { %499 = vmatprep.subr.bf16.mxu0 %v1168_v36  ;;  %542 = vmatprep.subr.bf16.mxu1 %v1170_v37 }
  0x5c   :  { %v132_v35 = vshrl.u32 %v131_v34, 7 }
  0x5e   :  { %500 = vmatpush1.bf16.msra.mxu0 %v1172_v38  ;;  %543 = vmatpush1.bf16.msra.mxu1 %v1173_v39  ;;  %v133_v36 = vsub.s32 0, %v132_v35  ;;  %v141_v37 = vsub.s32 2, %v132_v35  ;;  %v129_v38 = vld [vmem:[%s1441_s2] sm:$0xf]  ;;  %v137_v39 = vsub.s32 1, %v132_v35 }
  0x5f   :  { %501 = vmatprep.subr.bf16.mxu0 %v1174_v40  ;;  %544 = vmatprep.subr.bf16.mxu1 %v1176_v41  ;;  %v145_v40 = vsub.s32 3, %v132_v35 }
  0x60   :  { %v134_v41 = vrot.slane %v129_v38, %v133_v36 }
  0x62   :  { %502 = vmatpush1.bf16.msra.mxu0 %v1178_v42  ;;  %545 = vmatpush1.bf16.msra.mxu1 %v1179_v43  ;;  %v142_v42 = vrot.slane %v129_v38, %v141_v37  ;;  %v138_v43 = vrot.slane %v129_v38, %v137_v39 }
  0x63   :  { %503 = vmatprep.subr.bf16.mxu0 %v1180_v44  ;;  %546 = vmatprep.subr.bf16.mxu1 %v1182_v45  ;;  %v146_v44 = vrot.slane %v129_v38, %v145_v40 }
  0x66   :  { %504 = vmatpush1.bf16.msra.mxu0 %v1184_v46  ;;  %547 = vmatpush1.bf16.msra.mxu1 %v1185_v47 }
  0x67   :  { %505 = vmatprep.subr.bf16.mxu0 %v1186_v49  ;;  %548 = vmatprep.subr.bf16.mxu1 %v1188_v50 }
  0x6a   :  { %506 = vmatpush1.bf16.msra.mxu0 %v1190_v51  ;;  %549 = vmatpush1.bf16.msra.mxu1 %v1191_v52 }
  0x6b   :  { %507 = vmatprep.subr.bf16.mxu0 %v1192_v53  ;;  %550 = vmatprep.subr.bf16.mxu1 %v1194_v54 }
  0x6e   :  { %508 = vmatpush1.bf16.msra.mxu0 %v1196_v55  ;;  %551 = vmatpush1.bf16.msra.mxu1 %v1197_v56 }
  0x6f   :  { %509 = vmatprep.subr.bf16.mxu0 %v1198_v57  ;;  %552 = vmatprep.subr.bf16.mxu1 %v1200_v58 }
  0x72   :  { %510 = vmatpush1.bf16.msra.mxu0 %v1202_v59  ;;  %553 = vmatpush1.bf16.msra.mxu1 %v1203_v60 }
  0x73   :  { %511 = vmatprep.subr.bf16.mxu0 %v1204_v61  ;;  %554 = vmatprep.subr.bf16.mxu1 %v1206_v62 }
  0x76   :  { %512 = vmatpush1.bf16.msra.mxu0 %v1208_v63  ;;  %555 = vmatpush1.bf16.msra.mxu1 %v1209_v0 }
  0x77   :  { %1060 = vmatprep.subr.bf16.mxu0 %v1213_v1  ;;  %1082 = vmatprep.subr.bf16.mxu1 %v1214_v3 }
  0x79   :  { %514 = vmatmul.mubr.bf16.vlgmr.msra.gmra.mrb[0].mxu0 %v1210_v2  ;;  %557 = vmatmul.mubr.bf16.vlgmr.msra.gmra.mrb[0].mxu1 %v1210_v2 }
  0x7a   :  { %1061 = vmatpush3.bf16.msra.mxu0 %v1215_v4  ;;  %1083 = vmatpush3.bf16.msra.mxu1 %v1216_v5 }
  0x7b   :  { %1062 = vmatprep.subr.bf16.mxu0 %v1217_v6  ;;  %1084 = vmatprep.subr.bf16.mxu1 %v1218_v7 }
  0x7e   :  { %1063 = vmatpush3.bf16.msra.mxu0 %v1219_v8  ;;  %1085 = vmatpush3.bf16.msra.mxu1 %v1220_v9 }
  0x7f   :  { %1064 = vmatprep.subr.bf16.mxu0 %v1221_v10  ;;  %1086 = vmatprep.subr.bf16.mxu1 %v1222_v11  ;;  %v1018_v11 = vld [vmem:[%s1443_s4] ss:$0 sm:$0xff]  ;;  %s1311_s4 = scalar_lea.vmem %s940_s11, 128 }
  0x80   :  { %p1312_p10 = scmp.ne.s32.totalorder %s940_s11, %s1311_s4  ;;  %p1317_p12 = scmp.lt.s32.totalorder %s1311_s4, %s1311_s4 }
  0x82   :  { %1065 = vmatpush3.bf16.msra.mxu0 %v1223_v12  ;;  %1087 = vmatpush3.bf16.msra.mxu1 %v1224_v13  ;;  %p1318_p13 = por %p1317_p12, %p1316_p11 }
  0x83   :  { %1066 = vmatprep.subr.bf16.mxu0 %v1225_v14  ;;  %1088 = vmatprep.subr.bf16.mxu1 %v1226_v15 }
  0x84   :  { %p1319_p0 = pnand %p1318_p13, %p1312_p10 }
  0x86   :  { %1067 = vmatpush3.bf16.msra.mxu0 %v1227_v16  ;;  %1089 = vmatpush3.bf16.msra.mxu1 %v1228_v17 }
  0x87   :  { %1068 = vmatprep.subr.bf16.mxu0 %v1229_v18  ;;  %1090 = vmatprep.subr.bf16.mxu1 %v1230_v19 }
  0x8a   :  { %1069 = vmatpush3.bf16.msra.mxu0 %v1231_v20  ;;  %1091 = vmatpush3.bf16.msra.mxu1 %v1232_v21 }
  0x8b   :  { %1070 = vmatprep.subr.bf16.mxu0 %v1233_v22  ;;  %1092 = vmatprep.subr.bf16.mxu1 %v1234_v23 }
  0x8e   :  { %1071 = vmatpush3.bf16.msra.mxu0 %v1235_v24  ;;  %1093 = vmatpush3.bf16.msra.mxu1 %v1236_v25 }
  0x8f   :  { %1072 = vmatprep.subr.bf16.mxu0 %v1237_v26  ;;  %1094 = vmatprep.subr.bf16.mxu1 %v1238_v27 }
  0x92   :  { %1073 = vmatpush3.bf16.msra.mxu0 %v1239_v28  ;;  %1095 = vmatpush3.bf16.msra.mxu1 %v1240_v29 }
  0x93   :  { %1074 = vmatprep.subr.bf16.mxu0 %v1241_v30  ;;  %1096 = vmatprep.subr.bf16.mxu1 %v1242_v31 }
  0x96   :  { %1075 = vmatpush3.bf16.msra.mxu0 %v1243_v32  ;;  %1097 = vmatpush3.bf16.msra.mxu1 %v1244_v33 }
 0x14c   :  { %v515_v45 = vpop.f32.mrb[0].mxu0  ;;  %v558_v46 = vpop.f32.mrb[0].mxu1 }
 0x14d   :  { %v516_v47 = vadd.f32 %v515_v45, %v134_v41  ;;  %v559_v48 = vadd.f32 %v558_v46, %v142_v42  ;;  %v517_v49 = vpop.f32.mrb[1].mxu0  ;;  %v560_v50 = vpop.f32.mrb[1].mxu1 }
 0x14e   :  { %v518_v51 = vadd.f32 %v517_v49, %v138_v43  ;;  %v561_v52 = vadd.f32 %v560_v50, %v146_v44  ;;  %v519_v53 = vpop.f32.mrb[2].mxu0  ;;  %v562_v54 = vpop.f32.mrb[2].mxu1 }
 0x14f   :  { %v569_v55 = vmax.f32 %v559_v48, 0.0  ;;  %v520_v56 = vadd.f32 %v519_v53, %v134_v41  ;;  %v563_v57 = vadd.f32 %v562_v54, %v142_v42  ;;  %v521_v58 = vpop.f32.mrb[3].mxu0  ;;  %v564_v59 = vpop.f32.mrb[3].mxu1  ;;  %v567_v63 = vmax.f32 %v516_v47, 0.0 }
 0x150   :  { %v570_v60 = vmax.f32 %v561_v52, 0.0  ;;  %v522_v61 = vadd.f32 %v521_v58, %v138_v43  ;;  %v565_v62 = vadd.f32 %v564_v59, %v146_v44  ;;  %v568_v2 = vmax.f32 %v518_v51, 0.0 }
 0x151   :  { %v571_v0 = vmax.f32 %v520_v56, 0.0  ;;  %v573_v1 = vmax.f32 %v563_v57, 0.0 }
 0x152   :  { %v572_v3 = vmax.f32 %v522_v61, 0.0  ;;  %v574_v4 = vmax.f32 %v565_v62, 0.0 }
 0x153   :  { %v575_v5 = vpack.c.bf16 %v571_v0, %v567_v63  ;;  %v577_v6 = vpack.c.bf16 %v573_v1, %v569_v55 }
 0x154   :  { %v576_v7 = vpack.c.bf16 %v572_v3, %v568_v2  ;;  %v578_v8 = vpack.c.bf16 %v574_v4, %v570_v60 }
 0x156   :  { %874 = vmatprep.mubr.bf16.mxu0 %v576_v7  ;;  %915 = vmatprep.mubr.bf16.mxu1 %v578_v8 }
 0x157   :  { %875 = vmatmul.mubr.bf16.vlgmr.msra.gmra.mrb[4].mxu0 %v575_v5  ;;  %916 = vmatmul.mubr.bf16.vlgmr.msra.gmra.mrb[4].mxu1 %v577_v6 }
 0x22a   :  { %v1076_v9 = vpop.f32.mrb[4].mxu0  ;;  %v1098_v10 = vpop.f32.mrb[4].mxu1 }
 0x22b   :  { %v1077_v12 = vpop.f32.mrb[5].mxu0  ;;  %v1099_v13 = vpop.f32.mrb[5].mxu1 }
 0x22c   :  { %v1078_v14 = vadd.f32 %v1077_v12, %v1076_v9  ;;  %v1100_v15 = vadd.f32 %v1099_v13, %v1098_v10  ;;  %v1079_v16 = vpop.f32.mrb[6].mxu0  ;;  %v1101_v17 = vpop.f32.mrb[6].mxu1 }
 0x22d   :  { %v1080_v18 = vpop.f32.mrb[7].mxu0  ;;  %v1102_v19 = vpop.f32.mrb[7].mxu1 }
 0x22e   :  { %v877_v20 = vadd.f32 %v1078_v14, %v1018_v11  ;;  %v1081_v21 = vadd.f32 %v1080_v18, %v1079_v16  ;;  %v1103_v22 = vadd.f32 %v1102_v19, %v1101_v17 }
 0x230   :  { %v918_v23 = vadd.f32 %v1100_v15, %v877_v20  ;;  %v880_v24 = vadd.f32 %v1081_v21, %v1018_v11 }
 0x232   :  { %v921_v25 = vadd.f32 %v1103_v22, %v880_v24 }
 0x234   :  { %v1058_v26 = vpack.c.bf16 %v921_v25, %v918_v23 }
 0x236   :  { %1059 = vst [vmem:[#allocation8] sm:$0xff] %v1058_v26  }
 0x237   :  { %1322 = shalt.err (!%p1319_p0)
}
 0x238   :  { %s1323_s14 = scalar_lea.hbm %s1444_s5, 128 }
 0x239   :  { %p1324_p1 = scmp.ne.s32.totalorder %s1444_s5, %s1323_s14  ;;  %p1327_p2 = scmp.lt.u32.totalorder %s1323_s14, %s1444_s5 }
 0x23b   :  { %p1329_p3 = pnand %p1327_p2, %p1324_p1 }
 0x23d   :  { %1332 = shalt.err (!%p1329_p3)
}
 0x23e   :  { %945 = dma.vmem_to_hbm [thread:$0]  %s940_s11, 128, %s1444_s5, [#allocation4], %s1346_s0, %s1346_s0, %s1347_s30  }
 0x23f   :  { %1337 = dma.done.wait [#allocation4], 128  }
 0x240   :  { %1338 = vsyncadd [#allocation4], 4294967168 }
 0x241   :  { %949 = vsyncpa [#allocation3], 1 }
 0x242   :  { %950 = vsyncpa [#allocation6], 1 }
 0x243   :  { %951 = vsyncpa [#allocation4], 1 }

</bundles_post_ra>
